<compile_context>
chip_gen: v7x
topology: tpu7x:2x2x1
jax: 0.10.0
libtpu: 0.0.40
codegen_flags: <defaults>
</compile_context>

<pallas_src>
import math

import jax
import jax.numpy as jnp
from jax import lax
from jax.experimental import pallas as pl
from jax.experimental.pallas import tpu as pltpu


# ------------------------------- kernels --------------------------------------

def _gelu_exact_f32(h):
    # Exact erf-based GELU (PyTorch nn.GELU() default), computed in fp32.
    return 0.5 * h * (1.0 + lax.erf(h * (1.0 / math.sqrt(2.0))))


def _mlp_resident_kernel(x_ref, w_fc_ref, b_fc_ref, w_proj_ref, b_proj_ref, o_ref):
    # Weights are VMEM-resident (constant index_map); grid iterates only over
    # row tiles, so there is no accumulator / reduction axis.
    h = jnp.dot(x_ref[...], w_fc_ref[...], preferred_element_type=jnp.float32)
    h = h + b_fc_ref[...].astype(jnp.float32)
    h = _gelu_exact_f32(h)
    out = jnp.dot(h.astype(w_proj_ref.dtype), w_proj_ref[...],
                  preferred_element_type=jnp.float32)
    out = out + b_proj_ref[...].astype(jnp.float32)
    # Dropout (p=0 / eval mode): identity.
    o_ref[...] = out.astype(o_ref.dtype)


def _mlp_streaming_kernel(x_ref, w_fc_ref, b_fc_ref, w_proj_ref, b_proj_ref,
                          o_ref, acc_ref):
    # Hidden dim H is a reduction grid axis; weight slices stream through VMEM.
    h_idx = pl.program_id(1)

    @pl.when(h_idx == 0)
    def _init():
        acc_ref[...] = jnp.zeros_like(acc_ref)

    h = jnp.dot(x_ref[...], w_fc_ref[...], preferred_element_type=jnp.float32)
    h = h + b_fc_ref[...].astype(jnp.float32)
    h = _gelu_exact_f32(h)
    acc_ref[...] += jnp.dot(h.astype(w_proj_ref.dtype), w_proj_ref[...],
                            preferred_element_type=jnp.float32)

    @pl.when(h_idx == pl.num_programs(1) - 1)
    def _finalize():
        out = acc_ref[...] + b_proj_ref[...].astype(jnp.float32)
        # Dropout (p=0 / eval mode): identity.
        o_ref[...] = out.astype(o_ref.dtype)


# ------------------------------ helpers ----------------------------------------

def _vmem_capacity_bytes():
    """Per-core VMEM capacity; falls back to the v7x 64 MiB if the query fails."""
    try:
        cap = int(pltpu.get_tpu_info().vmem_capacity_bytes)
        if cap > 0:
            return cap
    except Exception:
        pass
    return 64 * 1024 * 1024


def _largest_divisor_tile(total, requested, align):
    """Largest multiple of `align` that is <= requested and divides `total`."""
    t = min(requested, total)
    t -= t % align
    while t >= align:
        if total % t == 0:
            return t
        t -= align
    return None


def _pick_row_tile(m, requested):
    """Row tile: prefer multiples of 256 (MXU edge), then 128, then 16/8."""
    t = None
    for a in (256, 128, 16, 8):
        t = _largest_divisor_tile(m, requested, a)
        if t is not None:
            break
    if t is None:
        t = m
    # Keep >= 2 row tiles for large M so the "parallel" axis can shard across
    # v7x's two TensorCores (irrelevant on the 1-TC v5e/v6e).
    if t == m and m >= 512:
        for a in (256, 128, 16, 8):
            t2 = _largest_divisor_tile(m, m // 2, a)
            if t2 is not None:
                return t2
    return t


def _pick_hidden_tile(h, requested):
    for a in (256, 128):
        t = _largest_divisor_tile(h, requested, a)
        if t is not None:
            return t
    return h


def _const_weight_spec(shape, single_buffer):
    """Full-array weight spec with constant index_map (fetched once per launch).
    When `single_buffer`, avoid paying 2x VMEM for a block that never changes."""
    index_map = lambda i: (0, 0)
    if single_buffer:
        try:
            return pl.BlockSpec(shape, index_map, pipeline_mode=pl.Buffered(1))
        except Exception:
            pass
    return pl.BlockSpec(shape, index_map)


# ------------------------------ public wrapper ----------------------------------

def mlp_pallas(x, w_fc, b_fc, w_proj, b_proj, *, tm=None, th=None,
               compute_dtype=jnp.bfloat16, force_streaming=False):
    """GPT MLP forward: dropout(c_proj(gelu(c_fc(x)))), dropout in eval mode.

    x:       (B, T, C)
    w_fc:    (C, 4C)   (nn.Linear(C, 4C).weight, pre-transposed)
    b_fc:    (4C,)
    w_proj:  (4C, C)   (nn.Linear(4C, C).weight, pre-transposed)
    b_proj:  (C,)
    compute_dtype: dtype for x / weights fed to the MXU (default bf16);
                   matmuls accumulate in fp32, output keeps x's dtype.
                   NOTE: production configs should keep C a multiple of 128
                   (lane-dense output); the tiny C in the self-test is
                   correctness-only.
    """
    B, T, C = x.shape
    H = w_fc.shape[1]
    M = B * T
    out_dtype = x.dtype

    x2 = x.reshape(M, C)
    b_fc2 = b_fc.reshape(1, H).astype(jnp.float32)
    b_proj2 = b_proj.reshape(1, C).astype(jnp.float32)

    if compute_dtype is not None:
        x2 = x2.astype(compute_dtype)
        w_fc = w_fc.astype(compute_dtype)
        w_proj = w_proj.astype(compute_dtype)

    in_bytes = jnp.dtype(x2.dtype).itemsize
    w_bytes = jnp.dtype(w_fc.dtype).itemsize
    out_bytes = jnp.dtype(out_dtype).itemsize

    vmem_cap = _vmem_capacity_bytes()
    # Usable budget: ~85% of physical, capped at ~100 MiB (v5e/v6e get the
    # full benefit of 128 MiB; v7x stays within its 64 MiB per TC).
    budget = min(int(vmem_cap * 0.85), 100 * 1024 * 1024)

    weight_bytes = (C * H + H * C) * w_bytes
    bias_bytes = (H + C) * 4
    flops = 4 * M * C * H                      # two matmuls: 2*M*C*H each

    # Single-buffer resident weights only when their 2x copy would eat a
    # meaningful slice of the budget (never triggered at toy sizes).
    single_buffer_weights = (2 * weight_bytes) > (budget // 4)
    wbuf = 1 if single_buffer_weights else 2

    def resident_need(tm_):
        return int(wbuf * weight_bytes + 2 * bias_bytes
                   + 2 * tm_ * C * in_bytes            # x tile (double-buffered)
                   + 2 * tm_ * C * out_bytes           # out tile
                   + tm_ * H * (4 + w_bytes)           # fp32 hidden act + cast copy
                   + tm_ * C * 4)                      # fp32 result before cast

    tm_res = _pick_row_tile(M, tm if tm is not None else 256)
    use_resident = (not force_streaming) and (resident_need(tm_res) * 1.25 <= budget)

    # ----------------------- resident-weight fast path --------------------------
    if use_resident:
        n_m = M // tm_res
        bytes_accessed = (M * C * in_bytes + weight_bytes + bias_bytes
                          + M * C * out_bytes)
        cost = pl.CostEstimate(flops=flops, transcendentals=M * H,
                               bytes_accessed=bytes_accessed)
        vmem_limit = min(budget, max(32 * 1024 * 1024,
                                     int(resident_need(tm_res) * 1.3)))

        def _build(single_buf):
            return pl.pallas_call(
                _mlp_resident_kernel,
                out_shape=jax.ShapeDtypeStruct((M, C), out_dtype),
                grid_spec=pltpu.PrefetchScalarGridSpec(
                    num_scalar_prefetch=0,
                    grid=(n_m,),                                      # rows only
                    in_specs=[
                        pl.BlockSpec((tm_res, C), lambda i: (i, 0)),  # x rows
                        _const_weight_spec((C, H), single_buf),       # W_fc (resident)
                        pl.BlockSpec((1, H), lambda i: (0, 0)),       # b_fc
                        _const_weight_spec((H, C), single_buf),       # W_proj (resident)
                        pl.BlockSpec((1, C), lambda i: (0, 0)),       # b_proj
                    ],
                    out_specs=pl.BlockSpec((tm_res, C), lambda i: (i, 0)),
                ),
                compiler_params=pltpu.CompilerParams(
                    dimension_semantics=("parallel",),
                    vmem_limit_bytes=vmem_limit),
                cost_estimate=cost,
            )

        try:
            out2 = _build(single_buffer_weights)(x2, w_fc, b_fc2, w_proj, b_proj2)
        except Exception:
            if not single_buffer_weights:
                raise
            # Fallback if single-buffered pipeline_mode is rejected.
            out2 = _build(False)(x2, w_fc, b_fc2, w_proj, b_proj2)
        return out2.reshape(B, T, C)

    # -------------------- streaming (H-reduction) fallback ----------------------
    # Large row tile so weight-DMA per tile is amortized past the roofline ridge.
    tm_s = _pick_row_tile(M, tm if tm is not None else
                          (768 if vmem_cap >= 96 * 1024 * 1024 else 512))
    th_s = _pick_hidden_tile(H, th if th is not None else 512)

    def streaming_need(tm_, th_):
        return int(2 * tm_ * C * in_bytes          # x tile
                   + 2 * C * th_ * w_bytes         # W_fc slice
                   + 2 * th_ * C * w_bytes         # W_proj slice
                   + 2 * th_ * 4 + 2 * C * 4       # bias slices
                   + 2 * tm_ * C * out_bytes       # out tile
                   + tm_ * C * 4                   # fp32 accumulator scratch
                   + tm_ * th_ * (4 + w_bytes))    # hidden act (+ cast copy)

    while streaming_need(tm_s, th_s) * 1.3 > budget:
        if th_s > 128:
            new_th = _pick_hidden_tile(H, th_s // 2)
            if new_th < th_s:
                th_s = new_th
                continue
        new_tm = _pick_row_tile(M, max(tm_s // 2, 8))
        if new_tm < tm_s:
            tm_s = new_tm
            continue
        break  # cannot shrink further

    n_m = M // tm_s
    n_h = H // th_s
    bytes_accessed = (M * C * in_bytes + n_m * weight_bytes
                      + n_m * bias_bytes + M * C * out_bytes)   # weights x n_m
    cost = pl.CostEstimate(flops=flops, transcendentals=M * H,
                           bytes_accessed=bytes_accessed)
    vmem_limit = min(budget, max(32 * 1024 * 1024,
                                 int(streaming_need(tm_s, th_s) * 1.3)))

    out2 = pl.pallas_call(
        _mlp_streaming_kernel,
        out_shape=jax.ShapeDtypeStruct((M, C), out_dtype),
        grid_spec=pltpu.PrefetchScalarGridSpec(
            num_scalar_prefetch=0,
            grid=(n_m, n_h),                                    # H last (reduction)
            in_specs=[
                pl.BlockSpec((tm_s, C), lambda i, h: (i, 0)),   # x rows (resident over H)
                pl.BlockSpec((C, th_s), lambda i, h: (0, h)),   # W_fc hidden slice
                pl.BlockSpec((1, th_s), lambda i, h: (0, h)),   # b_fc hidden slice
                pl.BlockSpec((th_s, C), lambda i, h: (h, 0)),   # W_proj hidden slice
                pl.BlockSpec((1, C), lambda i, h: (0, 0)),      # b_proj
            ],
            out_specs=pl.BlockSpec((tm_s, C), lambda i, h: (i, 0)),
            scratch_shapes=[pltpu.VMEM((tm_s, C), jnp.float32)],
        ),
        compiler_params=pltpu.CompilerParams(
            dimension_semantics=("parallel", "arbitrary"),
            vmem_limit_bytes=vmem_limit),
        cost_estimate=cost,
    )(x2, w_fc, b_fc2, w_proj, b_proj2)

    return out2.reshape(B, T, C)


# ------------------------------ reference & test --------------------------------

def _reference(x, w_fc, b_fc, w_proj, b_proj):
    h = x @ w_fc + b_fc
    h = 0.5 * h * (1.0 + lax.erf(h / jnp.sqrt(2.0).astype(h.dtype)))
    return h @ w_proj + b_proj


if __name__ == "__main__":
    # Small GPTConfig-like sizes: n_embd=32, bias=True, dropout=0.0
    B, T, C = 2, 8, 32
    H = 4 * C

    key = jax.random.PRNGKey(0)
    kx, k1, k2, k3, k4 = jax.random.split(key, 5)

    x = jax.random.normal(kx, (B, T, C), dtype=jnp.float32)
    # nn.Linear(C, 4C): weight (4C, C) -> stored transposed as (C, 4C)
    w_fc = jax.random.normal(k1, (C, H), dtype=jnp.float32) * (1.0 / math.sqrt(C))
    b_fc = jax.random.normal(k2, (H,), dtype=jnp.float32) * 0.01
    # nn.Linear(4C, C): weight (C, 4C) -> stored transposed as (4C, C)
    w_proj = jax.random.normal(k3, (H, C), dtype=jnp.float32) * (1.0 / math.sqrt(H))
    b_proj = jax.random.normal(k4, (C,), dtype=jnp.float32) * 0.01

    ref = _reference(x, w_fc, b_fc, w_proj, b_proj)

    # 1) fp32 resident-weight path (exact parity with the PyTorch fp32 module).
    out_f32 = mlp_pallas(x, w_fc, b_fc, w_proj, b_proj, compute_dtype=jnp.float32)
    out_f32 = jax.block_until_ready(out_f32)
    assert out_f32.shape == (B, T, C)
    assert jnp.allclose(out_f32, ref, atol=1e-4, rtol=1e-4), "fp32 mismatch vs reference"

    # 2) default bf16 MXU path (fp32 accumulation) — looser tolerance.
    out_bf16 = jax.block_until_ready(mlp_pallas(x, w_fc, b_fc, w_proj, b_proj))
    assert jnp.allclose(out_bf16, ref, atol=1e-1, rtol=5e-2), "bf16 mismatch vs reference"

    # 3) streaming (H-reduction) fallback path, forced at small shape.
    out_stream = jax.block_until_ready(
        mlp_pallas(x, w_fc, b_fc, w_proj, b_proj,
                   compute_dtype=jnp.float32, force_streaming=True))
    assert jnp.allclose(out_stream, ref, atol=1e-4, rtol=1e-4), "streaming mismatch"

    print("KERNEL_OK")
</pallas_src>

<mosaic_0001>
module attributes {stable_mosaic.version = 11 : i64} {
  func.func @_mlp_resident_kernel(%arg0: i32, %arg1: memref<16x32xf32, #tpu.memory_space<vmem>>, %arg2: memref<32x128xf32, #tpu.memory_space<vmem>>, %arg3: memref<1x128xf32, #tpu.memory_space<vmem>>, %arg4: memref<128x32xf32, #tpu.memory_space<vmem>>, %arg5: memref<1x32xf32, #tpu.memory_space<vmem>>, %arg6: memref<16x32xf32, #tpu.memory_space<vmem>>) attributes {dimension_semantics = [#tpu.dimension_semantics<parallel>], iteration_bounds = array<i64: 1>, scalar_prefetch = 0 : i64, scratch_operands = 0 : i64, tpu.core_type = #tpu.core_type<tc>, window_params = [{transform_indices = @transform_0, window_bounds = array<i64: 16, 32>}, {pipeline_mode = #tpu.pipeline_mode<synchronous>, transform_indices = @transform_1, window_bounds = array<i64: 32, 128>}, {pipeline_mode = #tpu.pipeline_mode<synchronous>, transform_indices = @transform_2, window_bounds = array<i64: 1, 128>}, {pipeline_mode = #tpu.pipeline_mode<synchronous>, transform_indices = @transform_3, window_bounds = array<i64: 128, 32>}, {pipeline_mode = #tpu.pipeline_mode<synchronous>, transform_indices = @transform_4, window_bounds = array<i64: 1, 32>}, {transform_indices = @transform_5, window_bounds = array<i64: 16, 32>}]} {
    %c0 = arith.constant 0 : index
    %c0_0 = arith.constant 0 : index
    %0 = vector.load %arg1[%c0, %c0_0] : memref<16x32xf32, #tpu.memory_space<vmem>>, vector<16x32xf32>
    %c0_1 = arith.constant 0 : index
    %c0_2 = arith.constant 0 : index
    %1 = vector.load %arg2[%c0_1, %c0_2] : memref<32x128xf32, #tpu.memory_space<vmem>>, vector<32x128xf32>
    %cst = arith.constant dense<0.000000e+00> : vector<16x128xf32>
    %2 = tpu.matmul %0, %1, %cst {dimension_numbers = #tpu.dot_dimension_numbers<[1], [0], [0], [1], [0, 0, 1, 1], [], []>} : vector<16x32xf32>, vector<32x128xf32>, vector<16x128xf32> -> vector<16x128xf32>
    %c0_3 = arith.constant 0 : index
    %c0_4 = arith.constant 0 : index
    %3 = vector.load %arg3[%c0_3, %c0_4] : memref<1x128xf32, #tpu.memory_space<vmem>>, vector<1x128xf32>
    %4 = vector.broadcast %3 : vector<1x128xf32> to vector<16x128xf32>
    %5 = arith.addf %2, %4 : vector<16x128xf32>
    %cst_5 = arith.constant 5.000000e-01 : f32
    %6 = vector.broadcast %cst_5 : f32 to vector<16x128xf32>
    %7 = arith.mulf %6, %5 : vector<16x128xf32>
    %cst_6 = arith.constant 0.707106769 : f32
    %8 = vector.broadcast %cst_6 : f32 to vector<16x128xf32>
    %9 = arith.mulf %5, %8 : vector<16x128xf32>
    %10 = math.erf %9 : vector<16x128xf32>
    %cst_7 = arith.constant 1.000000e+00 : f32
    %11 = vector.broadcast %cst_7 : f32 to vector<16x128xf32>
    %12 = arith.addf %11, %10 : vector<16x128xf32>
    %13 = arith.mulf %7, %12 : vector<16x128xf32>
    %c0_8 = arith.constant 0 : index
    %c0_9 = arith.constant 0 : index
    %14 = vector.load %arg4[%c0_8, %c0_9] : memref<128x32xf32, #tpu.memory_space<vmem>>, vector<128x32xf32>
    %cst_10 = arith.constant dense<0.000000e+00> : vector<16x32xf32>
    %15 = tpu.matmul %13, %14, %cst_10 {dimension_numbers = #tpu.dot_dimension_numbers<[1], [0], [0], [1], [0, 0, 1, 1], [], []>} : vector<16x128xf32>, vector<128x32xf32>, vector<16x32xf32> -> vector<16x32xf32>
    %c0_11 = arith.constant 0 : index
    %c0_12 = arith.constant 0 : index
    %16 = vector.load %arg5[%c0_11, %c0_12] : memref<1x32xf32, #tpu.memory_space<vmem>>, vector<1x32xf32>
    %17 = vector.broadcast %16 : vector<1x32xf32> to vector<16x32xf32>
    %18 = arith.addf %15, %17 : vector<16x32xf32>
    %c0_13 = arith.constant 0 : index
    %c0_14 = arith.constant 0 : index
    %19 = vector.load %arg6[%c0_13, %c0_14] : memref<16x32xf32, #tpu.memory_space<vmem>>, vector<16x32xf32>
    tpu.vector_store %arg6[%c0_13, %c0_14], %18 {strides = array<i32>} : memref<16x32xf32, #tpu.memory_space<vmem>>, vector<16x32xf32>,
    return
  }
  func.func @transform_0(%arg0: i32) -> (i32, i32) {
    %c0_i32 = arith.constant 0 : i32
    %c0_i32_0 = arith.constant 0 : i32
    return %arg0, %c0_i32 : i32, i32
  }
  func.func @transform_1(%arg0: i32) -> (i32, i32) {
    %c0_i32 = arith.constant 0 : i32
    %c0_i32_0 = arith.constant 0 : i32
    %c0_i32_1 = arith.constant 0 : i32
    return %c0_i32, %c0_i32_0 : i32, i32
  }
  func.func @transform_2(%arg0: i32) -> (i32, i32) {
    %c0_i32 = arith.constant 0 : i32
    %c0_i32_0 = arith.constant 0 : i32
    %c0_i32_1 = arith.constant 0 : i32
    return %c0_i32, %c0_i32_0 : i32, i32
  }
  func.func @transform_3(%arg0: i32) -> (i32, i32) {
    %c0_i32 = arith.constant 0 : i32
    %c0_i32_0 = arith.constant 0 : i32
    %c0_i32_1 = arith.constant 0 : i32
    return %c0_i32, %c0_i32_0 : i32, i32
  }
  func.func @transform_4(%arg0: i32) -> (i32, i32) {
    %c0_i32 = arith.constant 0 : i32
    %c0_i32_0 = arith.constant 0 : i32
    %c0_i32_1 = arith.constant 0 : i32
    return %c0_i32, %c0_i32_0 : i32, i32
  }
  func.func @transform_5(%arg0: i32) -> (i32, i32) {
    %c0_i32 = arith.constant 0 : i32
    %c0_i32_0 = arith.constant 0 : i32
    return %arg0, %c0_i32 : i32, i32
  }
}

</mosaic_0001>

<bundles_post_ra>
// kernel: tpu_custom_call.1
= control target key start
LH: loop header
LB: loop body
LE: loop exit
PB: predicated region body
PF: predicated region fallthrough
CT: control target
= control target key end

     0   :  { %vm34_vm0 = vcmask 261120   ;;  %s508_s0 = inlined_call_operand.vmem [shape: f32[16,32], index: 0, kind: input, shape index: {}]   ;;  %s509_s1 = inlined_call_operand.vmem [shape: f32[32,128], index: 1, kind: input, shape index: {}]   ;;  %s510_s2 = inlined_call_operand.vmem [shape: f32[1,128], index: 2, kind: input, shape index: {}]   ;;  %s511_s3 = inlined_call_operand.vmem [shape: f32[128,32], index: 3, kind: input, shape index: {}]   ;;  %s512_s4 = inlined_call_operand.vmem [shape: f32[1,32], index: 4, kind: input, shape index: {}]   ;;  %s513_s5 = inlined_call_operand.hbm [shape: f32[16,32], index: 5, kind: output, shape index: {}]  }
   0x1   :  { %v23_v0 = vld [vmem:[%s509_s1] sm:$0xff]  ;;  %v24_v1 = vld [vmem:[%s509_s1 + $0x8] sm:$0xff]  ;;  %v25_v2 = vld [vmem:[%s509_s1 + $0x10] sm:$0xff] }
   0x2   :  { %v316_v3 = vpack.c.bf16 %v24_v1, %v23_v0  ;;  %v26_v4 = vld [vmem:[%s509_s1 + $0x18] sm:$0xff]  ;;  %v21_v5 = vld [vmem:[%s508_s0] sm:$0xff]  ;;  %v127_v8 = vld [vmem:[%s511_s3 + $0x8] sm:$0xff] }
   0x3   :  { %v320_v6 = vpack.c.bf16 %v26_v4, %v25_v2  ;;  %278 = vmatprep.mubr.msk.f32.mxu0 %vm34_vm0, %v21_v5  ;;  %v126_v7 = vld [vmem:[%s511_s3] sm:$0xff]  ;;  %v128_v9 = vld [vmem:[%s511_s3 + $0x10] sm:$0xff]  ;;  %v129_v11 = vld [vmem:[%s511_s3 + $0x18] sm:$0xff] }
   0x4   :  { %317 = vmatprep.subr.bf16.mxu0 %v316_v3  ;;  %v324_v10 = vpack.c.bf16 %v127_v8, %v126_v7  ;;  %v328_v12 = vpack.c.bf16 %v129_v11, %v128_v9  ;;  %v130_v13 = vld [vmem:[%s511_s3 + $0x20] sm:$0xff]  ;;  %v131_v14 = vld [vmem:[%s511_s3 + $0x28] sm:$0xff] }
   0x5   :  { %319 = vmatpush3.bf16.msra.mxu0 %v316_v3 }
   0x6   :  { %10 = vsyncpa [#allocation3], 0  ;;  %321 = vmatprep.subr.bf16.mxu0 %v320_v6  ;;  %325 = vmatprep.subr.bf16.mxu1 %v324_v10  ;;  %v332_v15 = vpack.c.bf16 %v131_v14, %v130_v13  ;;  %v22_v16 = vld [vmem:[%s508_s0 + $0x8] sm:$0xff]  ;;  %v132_v17 = vld [vmem:[%s511_s3 + $0x30] sm:$0xff]  ;;  %s387_s11 = smov [#allocation2]  }
   0x7   :  { %327 = vmatpush3.bf16.msra.mxu1 %v324_v10  ;;  %v133_v18 = vld [vmem:[%s511_s3 + $0x38] sm:$0xff]  ;;  %v134_v20 = vld [vmem:[%s511_s3 + $0x40] sm:$0xff]  ;;  %v135_v21 = vld [vmem:[%s511_s3 + $0x48] sm:$0xff]  ;;  %s231_s12 = sshll.u32 %s387_s11, 4  ;;  %s232_s12 = int_to_ptr.vmem [resolvable:$true] %s231_s12 }
   0x8   :  { %329 = vmatprep.subr.bf16.mxu1 %v328_v12  ;;  %v336_v19 = vpack.c.bf16 %v133_v18, %v132_v17  ;;  %v340_v22 = vpack.c.bf16 %v135_v21, %v134_v20  ;;  %v136_v23 = vld [vmem:[%s511_s3 + $0x50] sm:$0xff]  ;;  %v137_v24 = vld [vmem:[%s511_s3 + $0x58] sm:$0xff]  ;;  %v138_v26 = vld [vmem:[%s511_s3 + $0x60] sm:$0xff]  ;;  %s363_s13 = scalar_lea.vmem %s232_s12, 256  ;;  %p368_p1 = scmp.lt.s32.totalorder %s232_s12, %s232_s12 }
   0x9   :  { %323 = vmatpush3.bf16.msra.mxu0 %v320_v6  ;;  %v344_v25 = vpack.c.bf16 %v137_v24, %v136_v23  ;;  %v139_v27 = vld [vmem:[%s511_s3 + $0x68] sm:$0xff]  ;;  %v140_v29 = vld [vmem:[%s511_s3 + $0x70] sm:$0xff]  ;;  %v141_v30 = vld [vmem:[%s511_s3 + $0x78] sm:$0xff]  ;;  %p364_p0 = scmp.ne.s32.totalorder %s232_s12, %s363_s13  ;;  %p369_p2 = scmp.lt.s32.totalorder %s363_s13, %s363_s13 }
   0xa   :  { %v348_v28 = vpack.c.bf16 %v139_v27, %v138_v26  ;;  %v352_v31 = vpack.c.bf16 %v141_v30, %v140_v29  ;;  %v242_v32 = vld [vmem:[%s510_s2] ss:$0 sm:$0xff] }
   0xb   :  { %331 = vmatpush3.bf16.msra.mxu1 %v328_v12  ;;  %v245_v47 = vld [vmem:[%s512_s4] ss:$0 sm:$0xff]  ;;  %p370_p3 = por %p369_p2, %p368_p1 }
   0xc   :  { %279 = vmatmul.mubr.msk.f32.vlgmr.msra.gmra.mrb[0].mxu0 %vm34_vm0, %v22_v16  ;;  %333 = vmatprep.subr.bf16.mxu1 %v332_v15 }
   0xd   :  { %p371_p4 = pnand %p370_p3, %p364_p0 }
   0xf   :  { %335 = vmatpush3.bf16.msra.mxu1 %v332_v15 }
  0x10   :  { %337 = vmatprep.subr.bf16.mxu1 %v336_v19 }
  0x13   :  { %339 = vmatpush3.bf16.msra.mxu1 %v336_v19 }
  0x14   :  { %341 = vmatprep.subr.bf16.mxu1 %v340_v22 }
  0x17   :  { %343 = vmatpush3.bf16.msra.mxu1 %v340_v22 }
  0x18   :  { %345 = vmatprep.subr.bf16.mxu1 %v344_v25 }
  0x1b   :  { %347 = vmatpush3.bf16.msra.mxu1 %v344_v25 }
  0x1c   :  { %349 = vmatprep.subr.bf16.mxu1 %v348_v28 }
  0x1f   :  { %351 = vmatpush3.bf16.msra.mxu1 %v348_v28 }
  0x20   :  { %353 = vmatprep.subr.bf16.mxu1 %v352_v31 }
  0x23   :  { %355 = vmatpush3.bf16.msra.mxu1 %v352_v31 }
  0xdf   :  { %v280_v33 = vpop.f32.mrb[0].mxu0 }
  0xe0   :  { %v113_v34 = vadd.f32 %v280_v33, %v242_v32  ;;  %v107_v35 = vpop.f32.mrb[1].mxu0 }
  0xe1   :  { %v108_v36 = vadd.f32 %v242_v32, %v107_v35 }
  0xe2   :  { %v119_v37 = vmul.f32 0.70710677, %v113_v34  ;;  %v117_v44 = vmul.f32 0.5, %v113_v34 }
  0xe3   :  { %v118_v38 = vmul.f32 0.70710677, %v108_v36  ;;  %v116_v42 = vmul.f32 0.5, %v108_v36 }
  0xe4   :  { %359 = verf.f32 %v119_v37 }
  0xe5   :  { %361 = verf.f32 %v118_v38 }
  0xee   :  { %v360_v39 = vpop.eup %359 }
  0xef   :  { %v362_v40 = vpop.eup %361  ;;  %v123_v41 = vadd.f32 1.0, %v360_v39 }
  0xf0   :  { %v122_v43 = vadd.f32 1.0, %v362_v40 }
  0xf1   :  { %v125_v46 = vmul.f32 %v123_v41, %v117_v44 }
  0xf2   :  { %v124_v45 = vmul.f32 %v122_v43, %v116_v42 }
  0xf4   :  { %313 = vmatprep.mubr.f32.mxu1 %v124_v45 }
  0xf5   :  { %314 = vmatmul.mubr.f32.vlgmr.msra.gmra.mrb[0].mxu1 %v125_v46 }
 0x1c8   :  { %v315_v48 = vpop.f32.mrb[0].mxu1 }
 0x1c9   :  { %v221_v49 = vadd.f32 %v315_v48, %v245_v47  ;;  %v215_v50 = vpop.f32.mrb[1].mxu1 }
 0x1ca   :  { %v216_v51 = vadd.f32 %v245_v47, %v215_v50 }
 0x1cb   :  { %225 = vst.msk [vmem:[#allocation2 + $0x8] sm:$0xff] %vm34_vm0, %v221_v49 }
 0x1cc   :  { %224 = vst.msk [vmem:[#allocation2] sm:$0xff] %vm34_vm0, %v216_v51 }
 0x1cd   :  { %374 = shalt.err (!%p371_p4)
}
 0x1ce   :  { %s375_s15 = scalar_lea.hbm %s513_s5, 256 }
 0x1cf   :  { %p376_p5 = scmp.ne.s32.totalorder %s513_s5, %s375_s15  ;;  %p379_p6 = scmp.lt.u32.totalorder %s375_s15, %s513_s5 }
 0x1d1   :  { %p381_p7 = pnand %p379_p6, %p376_p5 }
 0x1d3   :  { %384 = shalt.err (!%p381_p7)
}
 0x1d4   :  { %s388_s20 = smov 128   ;;  %s389_s21 = smov 8  }
 0x1d5   :  { %237 = dma.vmem_to_hbm [thread:$0]  %s232_s12, 256, %s513_s5, [#allocation3], %s388_s20, %s388_s20, %s389_s21  }
 0x1d6   :  { %385 = dma.done.wait [#allocation3], 256  }
 0x1d7   :  { %386 = vsyncadd [#allocation3], 4294967040 }
 0x1d8   :  { %241 = vsyncpa [#allocation3], 1 }

</bundles_post_ra>
